<compile_context>
chip_gen: v5e
topology: v5e:2x2
jax: 0.10.0
libtpu: 0.0.40
codegen_flags: <defaults>
</compile_context>

<pallas_src>
import jax
import jax.numpy as jnp
from jax.experimental import pallas as pl
from jax.experimental.pallas import tpu as pltpu


_MAX_LANE_COLS = 2048               # lane-dense slab width cap (multiple of 128)
_MAX_TILE_BYTES = 2 * 1024 * 1024   # per-buffer tile cap: double-buffered in+out
                                    # => <= 8 MiB VMEM, under v5e's 16 MiB default.


def _lane_dense_layout(total, rows_fallback, cols_fallback):
    """2-D (rows, cols) view of `total` elements with cols a large multiple of 128.

    Falls back to the natural (B*C, H*W) view when total isn't 128-divisible
    (odd resolutions) -- still correct, just with masked partial stores.
    """
    if total % 128 == 0:
        for k in range(_MAX_LANE_COLS // 128, 0, -1):
            cols = 128 * k
            if total % cols == 0:
                return total // cols, cols
    return rows_fallback, cols_fallback


def _pick_row_tile(rows, cols, itemsize):
    """Largest row tile that is a multiple of 8, divides rows, and keeps one
    (row_tile, cols) buffer within the per-buffer VMEM budget."""
    budget_rows = max(8, _MAX_TILE_BYTES // max(1, cols * itemsize))
    for cand in (512, 256, 128, 64, 32, 16, 8):
        if cand <= budget_rows and rows % cand == 0:
            return cand
    return rows  # full-extent block (always legal); only hit for tiny/odd shapes


# ---------------------------------------------------------------------------
# Kernels
# ---------------------------------------------------------------------------

def _modulated_noise_kernel(m_ref, noise_ref, out_ref):
    # m_ref:              SMEM f32[1]  (this frame's modulation scalar)
    # noise_ref / out_ref: VMEM (row_tile, cols) tiles of the lane-dense slab
    out_ref[...] = noise_ref[...] * m_ref[0]


def _modulated_noise_frames_kernel(mod_ref, noise_ref, out_ref):
    # mod_ref:   SMEM f32[T]             (chunk of per-frame modulation scalars)
    # noise_ref: VMEM (row_tile, cols)   index_map ignores t -> tile stays resident
    #                                    in VMEM across the (innermost) frame axis.
    # out_ref:   VMEM (row_tile, cols)   (leading frame dim squeezed by BlockSpec)
    t = pl.program_id(1)
    out_ref[...] = noise_ref[...] * mod_ref[t]


# ---------------------------------------------------------------------------
# Jitted wrappers
# ---------------------------------------------------------------------------

@jax.jit
def _modulated_noise_single(modulation, index, base_noise):
    B, C, H, W = base_noise.shape
    rows, cols = _lane_dense_layout(B * C * H * W, B * C, H * W)
    flat = base_noise.reshape(rows, cols)
    row_tile = _pick_row_tile(rows, cols, flat.dtype.itemsize)

    # Scalar select in the wrapper (clamped -> no OOB SMEM read inside the kernel).
    idx = jnp.clip(index, 0, modulation.shape[0] - 1)
    m = modulation[idx].astype(flat.dtype).reshape(1)

    out = pl.pallas_call(
        _modulated_noise_kernel,
        out_shape=jax.ShapeDtypeStruct((rows, cols), flat.dtype),
        grid=(rows // row_tile,),
        in_specs=[
            pl.BlockSpec(memory_space=pltpu.SMEM),                # modulation scalar
            pl.BlockSpec((row_tile, cols), lambda i: (i, 0)),     # noise tile
        ],
        out_specs=pl.BlockSpec((row_tile, cols), lambda i: (i, 0)),
        compiler_params=pltpu.CompilerParams(
            dimension_semantics=("parallel",)),
    )(m, flat)
    return out.reshape(B, C, H, W)


@jax.jit
def _modulated_noise_frames_jit(mod_chunk, base_noise):
    B, C, H, W = base_noise.shape
    T = mod_chunk.shape[0]
    rows, cols = _lane_dense_layout(B * C * H * W, B * C, H * W)
    flat = base_noise.reshape(rows, cols)
    row_tile = _pick_row_tile(rows, cols, flat.dtype.itemsize)

    out = pl.pallas_call(
        _modulated_noise_frames_kernel,
        out_shape=jax.ShapeDtypeStruct((T, rows, cols), flat.dtype),
        grid=(rows // row_tile, T),          # frame axis innermost -> noise tile resident
        in_specs=[
            pl.BlockSpec(memory_space=pltpu.SMEM),                      # mod chunk
            pl.BlockSpec((row_tile, cols), lambda i, t: (i, 0)),        # noise tile
        ],
        out_specs=pl.BlockSpec((None, row_tile, cols), lambda i, t: (t, i, 0)),
        compiler_params=pltpu.CompilerParams(
            dimension_semantics=("parallel", "arbitrary")),
    )(mod_chunk.astype(flat.dtype), flat)
    return out.reshape(T, B, C, H, W)


def modulated_noise(modulation, index, base_noise):
    """modulation[index] * base_noise with the multiply done in a Pallas kernel."""
    return _modulated_noise_single(modulation, jnp.asarray(index, jnp.int32), base_noise)


def modulated_noise_frames(mod_chunk, base_noise):
    """mod_chunk[t] * base_noise for every t, in ONE Pallas kernel. -> (T, B, C, H, W)."""
    return _modulated_noise_frames_jit(mod_chunk, base_noise)


class ModulatedNoise:
    """JAX/Pallas port of the PyTorch ModulatedNoise module."""

    def __init__(self, modulation, base_noise_fn):
        # modulation: f32[T] per-frame scalars; base_noise_fn() -> f32[B, C, H, W]
        self.modulation = jnp.asarray(modulation)
        self.base_noise_fn = base_noise_fn
        self.index = 0

    def forward(self):
        noise = modulated_noise(self.modulation, self.index, self.base_noise_fn())
        self.index += 1
        return noise

    def forward_frames(self, num_frames):
        """Batched fast path: the next `num_frames` frames in one pallas_call.

        Reads the base noise from HBM once instead of `num_frames` times and
        amortizes per-frame dispatch.  Assumes base_noise.forward() would return
        the same tensor for each of these frames (true for a fixed noise buffer).
        """
        mod_chunk = self.modulation[self.index:self.index + num_frames]
        frames = modulated_noise_frames(mod_chunk, self.base_noise_fn())
        self.index += num_frames
        return frames


if __name__ == "__main__":
    key = jax.random.PRNGKey(0)
    k_mod, k_noise, k_big = jax.random.split(key, 3)

    T = 8                      # number of frames (length of modulation)
    B, C, H, W = 2, 4, 16, 16  # base noise shape (NCHW)

    modulation = jax.random.uniform(k_mod, (T,), dtype=jnp.float32)
    base_noise_arr = jax.random.normal(k_noise, (B, C, H, W), dtype=jnp.float32)
    base_noise_fn = lambda: base_noise_arr

    module = ModulatedNoise(modulation, base_noise_fn)

    out0 = module.forward()            # uses index 0
    out1 = module.forward()            # uses index 1
    frames = module.forward_frames(3)  # uses indices 2, 3, 4 in one pallas_call
    jax.block_until_ready(out0)
    jax.block_until_ready(out1)
    jax.block_until_ready(frames)

    # Reference checks against plain-JAX semantics of the PyTorch module.
    ref0 = modulation[0] * base_noise_arr
    ref1 = modulation[1] * base_noise_arr
    ref_frames = modulation[2:5][:, None, None, None, None] * base_noise_arr[None]

    assert out0.shape == (B, C, H, W) and out0.dtype == jnp.float32
    assert jnp.allclose(out0, ref0, rtol=1e-6, atol=1e-6)
    assert jnp.allclose(out1, ref1, rtol=1e-6, atol=1e-6)
    assert frames.shape == (3, B, C, H, W)
    assert jnp.allclose(frames, ref_frames, rtol=1e-6, atol=1e-6)
    assert module.index == 5

    # Extra check that the multi-tile (grid > 1) pipelined path is exercised.
    big = jax.random.normal(k_big, (1, 4, 512, 512), dtype=jnp.float32)
    out_big = modulated_noise(modulation, 3, big)
    jax.block_until_ready(out_big)
    assert jnp.allclose(out_big, modulation[3] * big, rtol=1e-6, atol=1e-6)

    print("KERNEL_OK")
</pallas_src>

<mosaic_0001>
module attributes {stable_mosaic.version = 11 : i64} {
  func.func @_modulated_noise_kernel(%arg0: i32, %arg1: memref<1xf32, #tpu.memory_space<smem>>, %arg2: memref<1x2048xf32, #tpu.memory_space<vmem>>, %arg3: memref<1x2048xf32, #tpu.memory_space<vmem>>) attributes {dimension_semantics = [#tpu.dimension_semantics<parallel>], iteration_bounds = array<i64: 1>, scalar_prefetch = 0 : i64, scratch_operands = 0 : i64, tpu.core_type = #tpu.core_type<tc>, window_params = [{transform_indices = @transform_0, window_bounds = array<i64: 1>}, {transform_indices = @transform_1, window_bounds = array<i64: 1, 2048>}, {transform_indices = @transform_2, window_bounds = array<i64: 1, 2048>}]} {
    %c0 = arith.constant 0 : index
    %c0_0 = arith.constant 0 : index
    %0 = vector.load %arg2[%c0, %c0_0] : memref<1x2048xf32, #tpu.memory_space<vmem>>, vector<1x2048xf32>
    %c0_1 = arith.constant 0 : index
    %1 = memref.load %arg1[%c0_1] : memref<1xf32, #tpu.memory_space<smem>>
    %2 = vector.broadcast %1 : f32 to vector<1x2048xf32>
    %3 = arith.mulf %0, %2 : vector<1x2048xf32>
    %c0_2 = arith.constant 0 : index
    %c0_3 = arith.constant 0 : index
    %4 = vector.load %arg3[%c0_2, %c0_3] : memref<1x2048xf32, #tpu.memory_space<vmem>>, vector<1x2048xf32>
    tpu.vector_store %arg3[%c0_2, %c0_3], %3 {strides = array<i32>} : memref<1x2048xf32, #tpu.memory_space<vmem>>, vector<1x2048xf32>,
    return
  }
  func.func @transform_0(%arg0: i32) -> i32 {
    %c0_i32 = arith.constant 0 : i32
    %c0_i32_0 = arith.constant 0 : i32
    return %c0_i32 : i32
  }
  func.func @transform_1(%arg0: i32) -> (i32, i32) {
    %c0_i32 = arith.constant 0 : i32
    %c0_i32_0 = arith.constant 0 : i32
    return %arg0, %c0_i32 : i32, i32
  }
  func.func @transform_2(%arg0: i32) -> (i32, i32) {
    %c0_i32 = arith.constant 0 : i32
    %c0_i32_0 = arith.constant 0 : i32
    return %arg0, %c0_i32 : i32, i32
  }
}

</mosaic_0001>

<bundles_post_ra>
// kernel: _modulated_noise_single.1
= control target key start
LH: loop header
LB: loop body
LE: loop exit
PB: predicated region body
PF: predicated region fallthrough
CT: control target
= control target key end

     0   :  { %s54_s0 = inlined_call_operand.<no memory space> [shape: f32[1], index: 0, kind: input, shape index: {}]   ;;  %s55_s1 = inlined_call_operand.vmem [shape: f32[1,2048], index: 1, kind: input, shape index: {}]   ;;  %s56_s2 = inlined_call_operand.vmem [shape: f32[1,2048], index: 2, kind: output, shape index: {}]  }
   0x1   :  { %v12_v0 = vld [vmem:[%s55_s1] sm:$0xff]  ;;  %v15_v1 = vstv %s54_s0  ;;  %v13_v2 = vld [vmem:[%s55_s1 + $0x8] sm:$0xff] }
   0x2   :  { %v16_v3 = vmul.f32 %v15_v1, %v12_v0  ;;  %v17_v4 = vmul.f32 %v15_v1, %v13_v2 }
   0x4   :  { %18 = vst [vmem:[%s56_s2] sm:$0xff] %v16_v3 }
   0x5   :  { %19 = vst [vmem:[%s56_s2 + $0x8] sm:$0xff] %v17_v4 }

</bundles_post_ra>
